<compile_context>
chip_gen: v6e
topology: v6e:2x2x1
jax: 0.10.0
libtpu: 0.0.40
codegen_flags: <defaults>
</compile_context>

<pallas_src>
import functools

import numpy as np
import jax
import jax.numpy as jnp
from jax import lax
from jax.experimental import pallas as pl
from jax.experimental.pallas import tpu as pltpu


def _border_masks_np(H, W, B_blk):
    """(9, B_blk*H*W) f32 0/1 masks: 1 where the 3x3 tap lands inside the image."""
    yy = np.arange(H)[:, None]
    xx = np.arange(W)[None, :]
    rows = []
    for dy in (-1, 0, 1):
        for dx in (-1, 0, 1):
            valid = ((yy + dy >= 0) & (yy + dy <= H - 1) &
                     (xx + dx >= 0) & (xx + dx <= W - 1))
            rows.append(valid.reshape(H * W).astype(np.float32))
    m = np.stack(rows, axis=0)            # (9, HW), tap-major (dy, dx)
    return np.tile(m, (1, B_blk))         # tiled per image in the block


def _residual_kernel(x_ref, w3_ref, w1_ref, mask_ref, out_ref, *, W):
    # x_ref   : (Cin, L)       channels on sublanes, L = B_blk*H*W on lanes
    # w3_ref  : (R, 9*Cin)     3x3 weights, tap-major / channel-minor
    # w1_ref  : (Cout, R)      1x1 weights
    # mask_ref: (9, L)         0/1 border masks (tiled per image)
    # out_ref : (Cout, L)
    L = x_ref.shape[1]

    x = x_ref[...]                        # (Cin, L) f32
    xr = jnp.maximum(x, 0.0)              # ReLU(x); zero pad == ReLU(0)

    # Build the stacked, shifted, border-masked input S: (9*Cin, L).
    taps = []
    t = 0
    for dy in (-1, 0, 1):
        for dx in (-1, 0, 1):
            # shifted[:, p] == xr[:, p + dy*W + dx] (circular over the fused
            # axis); out-of-image neighbors are zeroed by the mask below.
            shift = (-(dy * W + dx)) % L
            s = pltpu.roll(xr, shift, 1) if shift else xr
            if not (dy == 0 and dx == 0):
                s = s * mask_ref[pl.ds(t, 1), :]     # (1, L) broadcast
            taps.append(s)
            t += 1
    S = jnp.concatenate(taps, axis=0)                # (9*Cin, L)

    # Single fused K=9*Cin matmul for the 3x3 conv, then ReLU, then 1x1 conv.
    h = jnp.dot(w3_ref[...], S, preferred_element_type=jnp.float32)   # (R, L)
    h = jnp.maximum(h, 0.0)
    y = jnp.dot(w1_ref[...], h, preferred_element_type=jnp.float32)   # (Cout, L)

    out_ref[...] = x + y                                               # residual


def prepare_weights(w3_oihw, w1_oihw):
    """One-time weight prep: (R,Cin,3,3)->(R,9*Cin) tap-major, (Cout,R,1,1)->(Cout,R)."""
    R, Cin = w3_oihw.shape[0], w3_oihw.shape[1]
    w3 = jnp.transpose(w3_oihw, (0, 2, 3, 1)).reshape(R, 9 * Cin).astype(jnp.float32)
    w1 = w1_oihw[:, :, 0, 0].astype(jnp.float32)
    return w3, w1


def _pick_batch_block(N, Cin, HW, target_bytes=128 * 1024):
    """Largest divisor of N whose per-step activation tile is <= target_bytes."""
    per_img = Cin * HW * 4
    tgt = max(1, target_bytes // per_img)
    b = 1
    for d in range(1, N + 1):
        if N % d == 0 and d <= tgt:
            b = d
    return b


def residual_forward(x_nchw, w3_flat, w1_mat):
    """x_nchw: (N, Cin, H, W); w3_flat: (R, 9*Cin); w1_mat: (Cout, R)."""
    N, Cin, H, W = x_nchw.shape
    R = w3_flat.shape[0]
    Cout = w1_mat.shape[0]
    assert Cout == Cin, "Residual add requires num_hiddens == in_channels"
    HW = H * W

    B_blk = _pick_batch_block(N, Cin, HW)
    n_steps = N // B_blk
    L = B_blk * HW

    # Channels on sublanes, fused batch*spatial on lanes (lane-dense stores).
    x = jnp.transpose(x_nchw.astype(jnp.float32), (1, 0, 2, 3)).reshape(Cin, N * HW)
    masks = jnp.asarray(_border_masks_np(H, W, B_blk))          # (9, L)

    kernel = functools.partial(_residual_kernel, W=W)

    flops = 2 * N * HW * R * (9 * Cin + Cout)
    bytes_accessed = (2 * N * Cin * HW + 9 * Cin * R + Cout * R + 9 * L) * 4

    out = pl.pallas_call(
        kernel,
        out_shape=jax.ShapeDtypeStruct((Cout, N * HW), jnp.float32),
        grid_spec=pltpu.PrefetchScalarGridSpec(
            num_scalar_prefetch=0,
            grid=(n_steps,),
            in_specs=[
                pl.BlockSpec((Cin, L), lambda b: (0, b)),        # activations
                pl.BlockSpec((R, 9 * Cin), lambda b: (0, 0)),    # 3x3 weights (resident)
                pl.BlockSpec((Cout, R), lambda b: (0, 0)),       # 1x1 weights (resident)
                pl.BlockSpec((9, L), lambda b: (0, 0)),          # border masks (resident)
            ],
            out_specs=pl.BlockSpec((Cout, L), lambda b: (0, b)),
        ),
        compiler_params=pltpu.CompilerParams(
            dimension_semantics=("parallel",)),
        cost_estimate=pl.CostEstimate(flops=flops, transcendentals=0,
                                      bytes_accessed=bytes_accessed),
    )(x, w3_flat, w1_mat, masks)

    return jnp.transpose(out.reshape(Cout, N, H, W), (1, 0, 2, 3))


def _reference(x_nchw, w3_oihw, w1_oihw):
    """Pure-JAX reference of the PyTorch forward (for validation only)."""
    h = jnp.maximum(x_nchw, 0.0)
    h = lax.conv_general_dilated(h, w3_oihw, window_strides=(1, 1),
                                 padding=((1, 1), (1, 1)),
                                 dimension_numbers=("NCHW", "OIHW", "NCHW"))
    h = jnp.maximum(h, 0.0)
    h = lax.conv_general_dilated(h, w1_oihw, window_strides=(1, 1),
                                 padding="VALID",
                                 dimension_numbers=("NCHW", "OIHW", "NCHW"))
    return x_nchw + h


if __name__ == "__main__":
    # Residual(in_channels=4, num_hiddens=4, num_residual_hiddens=8)
    N, Cin, H, W = 2, 4, 16, 16
    R = 8          # num_residual_hiddens
    Cout = Cin     # num_hiddens (must equal in_channels for the residual add)

    key = jax.random.PRNGKey(0)
    kx, kw3, kw1 = jax.random.split(key, 3)
    x = jax.random.normal(kx, (N, Cin, H, W), dtype=jnp.float32)
    w3 = jax.random.normal(kw3, (R, Cin, 3, 3), dtype=jnp.float32) * 0.1
    w1 = jax.random.normal(kw1, (Cout, R, 1, 1), dtype=jnp.float32) * 0.1

    # One-time weight prep (hoisted out of the per-call path).
    w3_flat, w1_mat = prepare_weights(w3, w1)
    fwd = jax.jit(residual_forward)

    out = fwd(x, w3_flat, w1_mat)
    jax.block_until_ready(out)

    ref = _reference(x, w3, w1)
    assert out.shape == (N, Cout, H, W)
    assert jnp.allclose(out, ref, atol=1e-4, rtol=1e-4), "mismatch vs reference"

    print("KERNEL_OK")
</pallas_src>

<mosaic_0001>
module attributes {stable_mosaic.version = 11 : i64} {
  func.func @_residual_kernel(%arg0: i32, %arg1: memref<4x512xf32, #tpu.memory_space<vmem>>, %arg2: memref<8x36xf32, #tpu.memory_space<vmem>>, %arg3: memref<4x8xf32, #tpu.memory_space<vmem>>, %arg4: memref<9x512xf32, #tpu.memory_space<vmem>>, %arg5: memref<4x512xf32, #tpu.memory_space<vmem>>) attributes {dimension_semantics = [#tpu.dimension_semantics<parallel>], iteration_bounds = array<i64: 1>, scalar_prefetch = 0 : i64, scratch_operands = 0 : i64, tpu.core_type = #tpu.core_type<tc>, window_params = [{transform_indices = @transform_0, window_bounds = array<i64: 4, 512>}, {pipeline_mode = #tpu.pipeline_mode<synchronous>, transform_indices = @transform_1, window_bounds = array<i64: 8, 36>}, {pipeline_mode = #tpu.pipeline_mode<synchronous>, transform_indices = @transform_2, window_bounds = array<i64: 4, 8>}, {pipeline_mode = #tpu.pipeline_mode<synchronous>, transform_indices = @transform_3, window_bounds = array<i64: 9, 512>}, {transform_indices = @transform_4, window_bounds = array<i64: 4, 512>}]} {
    %c0 = arith.constant 0 : index
    %c0_0 = arith.constant 0 : index
    %0 = vector.load %arg1[%c0, %c0_0] : memref<4x512xf32, #tpu.memory_space<vmem>>, vector<4x512xf32>
    %cst = arith.constant 0.000000e+00 : f32
    %1 = vector.broadcast %cst : f32 to vector<4x512xf32>
    %2 = arith.maximumf %0, %1 : vector<4x512xf32>
    %c17_i32 = arith.constant 17 : i32
    %3 = tpu.dynamic_rotate %2 by %c17_i32 dim 1 : vector<4x512xf32>, i32 -> vector<4x512xf32>
    %c0_1 = arith.constant 0 : index
    %c0_2 = arith.constant 0 : index
    %4 = vector.load %arg4[%c0_1, %c0_2] : memref<9x512xf32, #tpu.memory_space<vmem>>, vector<1x512xf32>
    %5 = vector.broadcast %4 : vector<1x512xf32> to vector<4x512xf32>
    %6 = arith.mulf %3, %5 : vector<4x512xf32>
    %c16_i32 = arith.constant 16 : i32
    %7 = tpu.dynamic_rotate %2 by %c16_i32 dim 1 : vector<4x512xf32>, i32 -> vector<4x512xf32>
    %c1 = arith.constant 1 : index
    %c0_3 = arith.constant 0 : index
    %8 = vector.load %arg4[%c1, %c0_3] : memref<9x512xf32, #tpu.memory_space<vmem>>, vector<1x512xf32>
    %9 = vector.broadcast %8 : vector<1x512xf32> to vector<4x512xf32>
    %10 = arith.mulf %7, %9 : vector<4x512xf32>
    %c15_i32 = arith.constant 15 : i32
    %11 = tpu.dynamic_rotate %2 by %c15_i32 dim 1 : vector<4x512xf32>, i32 -> vector<4x512xf32>
    %c2 = arith.constant 2 : index
    %c0_4 = arith.constant 0 : index
    %12 = vector.load %arg4[%c2, %c0_4] : memref<9x512xf32, #tpu.memory_space<vmem>>, vector<1x512xf32>
    %13 = vector.broadcast %12 : vector<1x512xf32> to vector<4x512xf32>
    %14 = arith.mulf %11, %13 : vector<4x512xf32>
    %c1_i32 = arith.constant 1 : i32
    %15 = tpu.dynamic_rotate %2 by %c1_i32 dim 1 : vector<4x512xf32>, i32 -> vector<4x512xf32>
    %c3 = arith.constant 3 : index
    %c0_5 = arith.constant 0 : index
    %16 = vector.load %arg4[%c3, %c0_5] : memref<9x512xf32, #tpu.memory_space<vmem>>, vector<1x512xf32>
    %17 = vector.broadcast %16 : vector<1x512xf32> to vector<4x512xf32>
    %18 = arith.mulf %15, %17 : vector<4x512xf32>
    %c511_i32 = arith.constant 511 : i32
    %19 = tpu.dynamic_rotate %2 by %c511_i32 dim 1 : vector<4x512xf32>, i32 -> vector<4x512xf32>
    %c5 = arith.constant 5 : index
    %c0_6 = arith.constant 0 : index
    %20 = vector.load %arg4[%c5, %c0_6] : memref<9x512xf32, #tpu.memory_space<vmem>>, vector<1x512xf32>
    %21 = vector.broadcast %20 : vector<1x512xf32> to vector<4x512xf32>
    %22 = arith.mulf %19, %21 : vector<4x512xf32>
    %c497_i32 = arith.constant 497 : i32
    %23 = tpu.dynamic_rotate %2 by %c497_i32 dim 1 : vector<4x512xf32>, i32 -> vector<4x512xf32>
    %c6 = arith.constant 6 : index
    %c0_7 = arith.constant 0 : index
    %24 = vector.load %arg4[%c6, %c0_7] : memref<9x512xf32, #tpu.memory_space<vmem>>, vector<1x512xf32>
    %25 = vector.broadcast %24 : vector<1x512xf32> to vector<4x512xf32>
    %26 = arith.mulf %23, %25 : vector<4x512xf32>
    %c496_i32 = arith.constant 496 : i32
    %27 = tpu.dynamic_rotate %2 by %c496_i32 dim 1 : vector<4x512xf32>, i32 -> vector<4x512xf32>
    %c7 = arith.constant 7 : index
    %c0_8 = arith.constant 0 : index
    %28 = vector.load %arg4[%c7, %c0_8] : memref<9x512xf32, #tpu.memory_space<vmem>>, vector<1x512xf32>
    %29 = vector.broadcast %28 : vector<1x512xf32> to vector<4x512xf32>
    %30 = arith.mulf %27, %29 : vector<4x512xf32>
    %c495_i32 = arith.constant 495 : i32
    %31 = tpu.dynamic_rotate %2 by %c495_i32 dim 1 : vector<4x512xf32>, i32 -> vector<4x512xf32>
    %c8 = arith.constant 8 : index
    %c0_9 = arith.constant 0 : index
    %32 = vector.load %arg4[%c8, %c0_9] : memref<9x512xf32, #tpu.memory_space<vmem>>, vector<1x512xf32>
    %33 = vector.broadcast %32 : vector<1x512xf32> to vector<4x512xf32>
    %34 = arith.mulf %31, %33 : vector<4x512xf32>
    %35 = tpu.concatenate %6, %10, %14, %18, %2, %22, %26, %30, %34 in 0 : vector<4x512xf32>, vector<4x512xf32>, vector<4x512xf32>, vector<4x512xf32>, vector<4x512xf32>, vector<4x512xf32>, vector<4x512xf32>, vector<4x512xf32>, vector<4x512xf32> -> vector<36x512xf32>
    %c0_10 = arith.constant 0 : index
    %c0_11 = arith.constant 0 : index
    %36 = vector.load %arg2[%c0_10, %c0_11] : memref<8x36xf32, #tpu.memory_space<vmem>>, vector<8x36xf32>
    %cst_12 = arith.constant dense<0.000000e+00> : vector<8x512xf32>
    %37 = tpu.matmul %36, %35, %cst_12 {dimension_numbers = #tpu.dot_dimension_numbers<[1], [0], [0], [1], [0, 0, 1, 1], [], []>} : vector<8x36xf32>, vector<36x512xf32>, vector<8x512xf32> -> vector<8x512xf32>
    %cst_13 = arith.constant 0.000000e+00 : f32
    %38 = vector.broadcast %cst_13 : f32 to vector<8x512xf32>
    %39 = arith.maximumf %37, %38 : vector<8x512xf32>
    %c0_14 = arith.constant 0 : index
    %c0_15 = arith.constant 0 : index
    %40 = vector.load %arg3[%c0_14, %c0_15] : memref<4x8xf32, #tpu.memory_space<vmem>>, vector<4x8xf32>
    %cst_16 = arith.constant dense<0.000000e+00> : vector<4x512xf32>
    %41 = tpu.matmul %40, %39, %cst_16 {dimension_numbers = #tpu.dot_dimension_numbers<[1], [0], [0], [1], [0, 0, 1, 1], [], []>} : vector<4x8xf32>, vector<8x512xf32>, vector<4x512xf32> -> vector<4x512xf32>
    %42 = arith.addf %0, %41 : vector<4x512xf32>
    %c0_17 = arith.constant 0 : index
    %c0_18 = arith.constant 0 : index
    %43 = vector.load %arg5[%c0_17, %c0_18] : memref<4x512xf32, #tpu.memory_space<vmem>>, vector<4x512xf32>
    tpu.vector_store %arg5[%c0_17, %c0_18], %42 {strides = array<i32>} : memref<4x512xf32, #tpu.memory_space<vmem>>, vector<4x512xf32>,
    return
  }
  func.func @transform_0(%arg0: i32) -> (i32, i32) {
    %c0_i32 = arith.constant 0 : i32
    %c0_i32_0 = arith.constant 0 : i32
    return %c0_i32, %arg0 : i32, i32
  }
  func.func @transform_1(%arg0: i32) -> (i32, i32) {
    %c0_i32 = arith.constant 0 : i32
    %c0_i32_0 = arith.constant 0 : i32
    %c0_i32_1 = arith.constant 0 : i32
    return %c0_i32, %c0_i32_0 : i32, i32
  }
  func.func @transform_2(%arg0: i32) -> (i32, i32) {
    %c0_i32 = arith.constant 0 : i32
    %c0_i32_0 = arith.constant 0 : i32
    %c0_i32_1 = arith.constant 0 : i32
    return %c0_i32, %c0_i32_0 : i32, i32
  }
  func.func @transform_3(%arg0: i32) -> (i32, i32) {
    %c0_i32 = arith.constant 0 : i32
    %c0_i32_0 = arith.constant 0 : i32
    %c0_i32_1 = arith.constant 0 : i32
    return %c0_i32, %c0_i32_0 : i32, i32
  }
  func.func @transform_4(%arg0: i32) -> (i32, i32) {
    %c0_i32 = arith.constant 0 : i32
    %c0_i32_0 = arith.constant 0 : i32
    return %c0_i32, %arg0 : i32, i32
  }
}

</mosaic_0001>

<bundles_post_ra>
// kernel: residual_forward.1
= control target key start
LH: loop header
LB: loop body
LE: loop exit
PB: predicated region body
PF: predicated region fallthrough
CT: control target
= control target key end

     0   :  { %s763_s19 = smov 112   ;;  %s765_s20 = smov 127   ;;  %v770_v6 = vmov 0.0   ;;  %v35_v9 = vlaneseq  ;;  %vm396_vm1 = vcmask 1043456   ;;  %vm414_vm9 = vcmask 293888   ;;  %s1017_s0 = inlined_call_operand.vmem [shape: f32[4,512], index: 0, kind: input, shape index: {}]   ;;  %s1018_s3 = inlined_call_operand.vmem [shape: f32[9,512], index: 3, kind: input, shape index: {}]   ;;  %s1019_s1 = inlined_call_operand.vmem [shape: f32[8,36], index: 1, kind: input, shape index: {}]   ;;  %s1020_s2 = inlined_call_operand.vmem [shape: f32[4,8], index: 2, kind: input, shape index: {}]   ;;  %s1021_s4 = inlined_call_operand.vmem [shape: f32[4,512], index: 4, kind: output, shape index: {}]  }
   0x1   :  { %v800_v0 = vld [vmem:[%s1017_s0 + $0x8] sm:$0xff]  ;;  %v805_v1 = vld [vmem:[%s1017_s0] sm:$0xff]  ;;  %s764_s0 = smov 111   ;;  %s766_s21 = smov 113   ;;  %494 = vmatprep.mubr.f32.mxu0 %v770_v6  ;;  %565 = vmatprep.mubr.f32.mxu1 %v770_v6  ;;  %vm577_vm10 = vcmask 64512  }
   0x2   :  { %v808_v2 = vmax.f32 %v800_v0, 0.0  ;;  %v811_v3 = vmax.f32 %v805_v1, 0.0  ;;  %s767_s22 = smov 1   ;;  %s768_s23 = smov 16   ;;  %v45_v10 = vshrl.u32 %v35_v9, 7  ;;  %v855_v13 = vand.u32 127, %v35_v9 }
   0x3   :  { %s769_s24 = smov 15   ;;  %s771_s25 = smov 17   ;;  %v745_v18 = vld [vmem:[%s1018_s3 + $0x20] ss:$8 sm:$0xf] }
   0x4   :  { %272 = vrot.lane.b32.xlu1 %v808_v2, %s763_s19  ;;  %268 = vrot.lane.b32.xlu0 %v811_v3, %s763_s19  ;;  %v817_v4 = vcombine.high %v808_v2, %v808_v2  ;;  %v821_v5 = vcombine.high %v811_v3, %v811_v3  ;;  %v857_v14 = vsub.s32 2, %v45_v10  ;;  %v859_v15 = vsub.s32 3, %v45_v10  ;;  %v744_v35 = vld [vmem:[%s1018_s3 + $0x7] ss:$8 sm:$0xf] }
   0x5   :  { %v861_v16 = vsub.s32 1, %v45_v10  ;;  %v866_v20 = vsub.s32 0, %v45_v10  ;;  %vm316_vm0 = vcmp.lt.s32.totalorder %v855_v13, 111  ;;  %vm276_vm2 = vcmp.lt.s32.totalorder %v855_v13, 112 }
   0x6   :  { %v335_v21 = vrot.slane %v745_v18, %v857_v14  ;;  %v339_v23 = vrot.slane %v745_v18, %v859_v15  ;;  %v295_v38 = vrot.slane %v744_v35, %v857_v14  ;;  %v299_v39 = vrot.slane %v744_v35, %v859_v15  ;;  %v742_v41 = vld [vmem:[%s1018_s3 + $0x5] ss:$8 sm:$0xf]  ;;  %v743_v53 = vld [vmem:[%s1018_s3 + $0x6] ss:$8 sm:$0xf] }
   0x7   :  { %v331_v22 = vrot.slane %v745_v18, %v861_v16  ;;  %v327_v24 = vrot.slane %v745_v18, %v866_v20  ;;  %v291_v40 = vrot.slane %v744_v35, %v861_v16  ;;  %vm196_vm3 = vcmp.lt.s32.totalorder %v855_v13, 127 }
   0x8   :  { %274 = vrot.lane.b32.xlu1 %v817_v4, %s763_s19  ;;  %270 = vrot.lane.b32.xlu0 %v821_v5, %s763_s19  ;;  %v219_v44 = vrot.slane %v742_v41, %v859_v15  ;;  %v287_v47 = vrot.slane %v744_v35, %v866_v20  ;;  %v207_v50 = vrot.slane %v742_v41, %v866_v20  ;;  %vm236_vm4 = vcmp.lt.s32.totalorder %v855_v13, 113 }
   0x9   :  { %v211_v51 = vrot.slane %v742_v41, %v861_v16  ;;  %v215_v52 = vrot.slane %v742_v41, %v857_v14  ;;  %v259_v9 = vrot.slane %v743_v53, %v859_v15  ;;  %vm156_vm5 = vcmp.lt.s32.totalorder %v855_v13, 1 }
   0xa   :  { %vm76_vm6 = vcmp.lt.s32.totalorder %v855_v13, 16  ;;  %vm116_vm7 = vcmp.lt.s32.totalorder %v855_v13, 15  ;;  %vm37_vm8 = vcmp.lt.s32.totalorder %v855_v13, 17 }
   0xc   :  { %310 = vrot.lane.b32.xlu1 %v821_v5, %s764_s0  ;;  %308 = vrot.lane.b32.xlu0 %v811_v3, %s764_s0 }
  0x10   :  { %314 = vrot.lane.b32.xlu1 %v817_v4, %s764_s0  ;;  %312 = vrot.lane.b32.xlu0 %v808_v2, %s764_s0 }
  0x14   :  { %190 = vrot.lane.b32.xlu1 %v821_v5, %s765_s20  ;;  %188 = vrot.lane.b32.xlu0 %v811_v3, %s765_s20 }
  0x18   :  { %194 = vrot.lane.b32.xlu1 %v817_v4, %s765_s20  ;;  %192 = vrot.lane.b32.xlu0 %v808_v2, %s765_s20 }
  0x1c   :  { %230 = vrot.lane.b32.xlu1 %v821_v5, %s766_s21  ;;  %228 = vrot.lane.b32.xlu0 %v811_v3, %s766_s21 }
  0x20   :  { %234 = vrot.lane.b32.xlu1 %v817_v4, %s766_s21  ;;  %232 = vrot.lane.b32.xlu0 %v808_v2, %s766_s21 }
  0x24   :  { %150 = vrot.lane.b32.xlu1 %v821_v5, %s767_s22  ;;  %148 = vrot.lane.b32.xlu0 %v811_v3, %s767_s22 }
  0x28   :  { %154 = vrot.lane.b32.xlu1 %v817_v4, %s767_s22  ;;  %152 = vrot.lane.b32.xlu0 %v808_v2, %s767_s22 }
  0x2c   :  { %70 = vrot.lane.b32.xlu1 %v821_v5, %s768_s23  ;;  %68 = vrot.lane.b32.xlu0 %v811_v3, %s768_s23 }
  0x30   :  { %74 = vrot.lane.b32.xlu1 %v817_v4, %s768_s23  ;;  %72 = vrot.lane.b32.xlu0 %v808_v2, %s768_s23 }
  0x34   :  { %110 = vrot.lane.b32.xlu1 %v821_v5, %s769_s24  ;;  %108 = vrot.lane.b32.xlu0 %v811_v3, %s769_s24 }
  0x38   :  { %114 = vrot.lane.b32.xlu1 %v817_v4, %s769_s24  ;;  %112 = vrot.lane.b32.xlu0 %v808_v2, %s769_s24 }
  0x3c   :  { %29 = vrot.lane.b32.xlu1 %v821_v5, %s771_s25  ;;  %27 = vrot.lane.b32.xlu0 %v811_v3, %s771_s25 }
  0x40   :  { %33 = vrot.lane.b32.xlu1 %v817_v4, %s771_s25  ;;  %31 = vrot.lane.b32.xlu0 %v808_v2, %s771_s25 }
  0x76   :  { %v273_v7 = vpop.permute.xlu1 %272  ;;  %v269_v8 = vpop.permute.xlu0 %268 }
  0x7a   :  { %v275_v11 = vpop.permute.xlu1 %274  ;;  %v271_v12 = vpop.permute.xlu0 %270 }
  0x7b   :  { %v277_v42 = vsel %vm276_vm2, %v273_v7, %v275_v11  ;;  %v280_v43 = vsel %vm276_vm2, %v275_v11, %v269_v8  ;;  %v278_v48 = vsel %vm276_vm2, %v271_v12, %v273_v7  ;;  %v279_v56 = vsel %vm276_vm2, %v269_v8, %v271_v12 }
  0x7c   :  { %v306_v54 = vmul.f32 %v295_v38, %v277_v42  ;;  %v307_v55 = vmul.f32 %v299_v39, %v280_v43  ;;  %v305_v58 = vmul.f32 %v291_v40, %v278_v48  ;;  %v247_v7 = vrot.slane %v743_v53, %v866_v20 }
  0x7d   :  { %v251_v11 = vrot.slane %v743_v53, %v861_v16  ;;  %v255_v12 = vrot.slane %v743_v53, %v857_v14 }
  0x7e   :  { %v311_v17 = vpop.permute.xlu1 %310  ;;  %v309_v19 = vpop.permute.xlu0 %308 }
  0x7f   :  { %v319_v25 = vsel %vm316_vm0, %v309_v19, %v311_v17 }
  0x80   :  { %v344_v34 = vmul.f32 %v327_v24, %v319_v25 }
  0x82   :  { %v315_v26 = vpop.permute.xlu1 %314  ;;  %v313_v27 = vpop.permute.xlu0 %312 }
  0x83   :  { %v320_v28 = vsel %vm316_vm0, %v315_v26, %v309_v19  ;;  %v317_v29 = vsel %vm316_vm0, %v313_v27, %v315_v26  ;;  %v318_v30 = vsel %vm316_vm0, %v311_v17, %v313_v27  ;;  %v304_v17 = vmul.f32 %v287_v47, %v279_v56 }
  0x84   :  { %v346_v31 = vmul.f32 %v335_v21, %v317_v29  ;;  %v345_v32 = vmul.f32 %v331_v22, %v318_v30  ;;  %v347_v33 = vmul.f32 %v339_v23, %v320_v28  ;;  %v390_v21 = vrot.slane %v306_v54, 4 }
  0x85   :  { %v391_v22 = vrot.slane %v307_v55, 4  ;;  %v389_v23 = vrot.slane %v305_v58, 4  ;;  %v388_v35 = vrot.slane %v304_v17, 4  ;;  %v42_v17 = vld [vmem:[%s1018_s3] ss:$8 sm:$0xf] }
  0x86   :  { %v191_v36 = vpop.permute.xlu1 %190  ;;  %746 = vmatprep.subr.msk.mxu0 %vm396_vm1, %v345_v32  ;;  %749 = vmatprep.subr.msk.mxu1 %vm396_vm1, %v347_v33  ;;  %v189_v37 = vpop.permute.xlu0 %188 }
  0x87   :  { %747 = vmatpush1.msk.msra.mxu0 %vm396_vm1, %v344_v34  ;;  %750 = vmatpush1.msk.msra.mxu1 %vm396_vm1, %v346_v31  ;;  %v199_v59 = vsel %vm196_vm3, %v189_v37, %v191_v36 }
  0x88   :  { %v224_v18 = vmul.f32 %v207_v50, %v199_v59  ;;  %v741_v50 = vld [vmem:[%s1018_s3 + $0x3] ss:$8 sm:$0xf] }
  0x89   :  { %v175_v54 = vrot.slane %v741_v50, %v857_v14  ;;  %v179_v55 = vrot.slane %v741_v50, %v859_v15 }
  0x8a   :  { %v195_v45 = vpop.permute.xlu1 %194  ;;  %v193_v46 = vpop.permute.xlu0 %192 }
  0x8b   :  { %v200_v49 = vsel %vm196_vm3, %v195_v45, %v189_v37  ;;  %v198_v57 = vsel %vm196_vm3, %v191_v36, %v193_v46  ;;  %v197_v61 = vsel %vm196_vm3, %v193_v46, %v195_v45  ;;  %v376_v36 = vrot.slane %v224_v18, 4 }
  0x8c   :  { %v227_v60 = vmul.f32 %v219_v44, %v200_v49  ;;  %v225_v10 = vmul.f32 %v211_v51, %v198_v57  ;;  %v226_v19 = vmul.f32 %v215_v52, %v197_v61  ;;  %v171_v51 = vrot.slane %v741_v50, %v861_v16 }
  0x8d   :  { %v405_v46 = vsel %vm396_vm1, %v811_v3, %v376_v36  ;;  %v167_v3 = vrot.slane %v741_v50, %v866_v20 }
  0x8e   :  { %v231_v62 = vpop.permute.xlu1 %230  ;;  %v229_v63 = vpop.permute.xlu0 %228  ;;  %v379_v24 = vrot.slane %v227_v60, 4  ;;  %v377_v31 = vrot.slane %v225_v10, 4  ;;  %v378_v37 = vrot.slane %v226_v19, 4  ;;  %v739_v60 = vld [vmem:[%s1018_s3 + $0x1] ss:$8 sm:$0xf] }
  0x8f   :  { %v239_v8 = vsel %vm236_vm4, %v229_v63, %v231_v62  ;;  %v91_v10 = vrot.slane %v739_v60, %v861_v16  ;;  %v95_v19 = vrot.slane %v739_v60, %v857_v14 }
  0x90   :  { %v264_v27 = vmul.f32 %v247_v7, %v239_v8  ;;  %v406_v44 = vsel %vm396_vm1, %v821_v5, %v377_v31  ;;  %v408_v45 = vsel %vm396_vm1, %v817_v4, %v379_v24  ;;  %v407_v47 = vsel %vm396_vm1, %v808_v2, %v378_v37  ;;  %v740_v2 = vld [vmem:[%s1018_s3 + $0x2] ss:$8 sm:$0xf] }
  0x91   :  { %v87_v8 = vrot.slane %v739_v60, %v866_v20 }
  0x92   :  { %v235_v25 = vpop.permute.xlu1 %234  ;;  %v233_v26 = vpop.permute.xlu0 %232  ;;  %v409_v43 = vsel %vm396_vm1, %v264_v27, %v388_v35 }
  0x93   :  { %v240_v28 = vsel %vm236_vm4, %v235_v25, %v229_v63  ;;  %v237_v29 = vsel %vm236_vm4, %v233_v26, %v235_v25  ;;  %v238_v30 = vsel %vm236_vm4, %v231_v62, %v233_v26  ;;  %v131_v62 = vrot.slane %v740_v2, %v861_v16 }
  0x94   :  { %v267_v32 = vmul.f32 %v259_v9, %v240_v28  ;;  %v265_v33 = vmul.f32 %v251_v11, %v238_v30  ;;  %v266_v34 = vmul.f32 %v255_v12, %v237_v29  ;;  %v135_v25 = vrot.slane %v740_v2, %v857_v14 }
  0x95   :  { %v139_v26 = vrot.slane %v740_v2, %v859_v15  ;;  %v99_v28 = vrot.slane %v739_v60, %v859_v15  ;;  %v51_v29 = vrot.slane %v42_v17, %v861_v16 }
  0x96   :  { %v151_v38 = vpop.permute.xlu1 %150  ;;  %v149_v39 = vpop.permute.xlu0 %148  ;;  %v410_v40 = vsel %vm396_vm1, %v265_v33, %v389_v23  ;;  %v412_v41 = vsel %vm396_vm1, %v267_v32, %v391_v22  ;;  %v411_v42 = vsel %vm396_vm1, %v266_v34, %v390_v21  ;;  %v127_v22 = vrot.slane %v740_v2, %v866_v20 }
  0x97   :  { %454 = vmatprep.subr.mxu0 %v410_v40  ;;  %525 = vmatprep.subr.mxu1 %v412_v41  ;;  %v159_v52 = vsel %vm156_vm5, %v149_v39, %v151_v38  ;;  %v59_v2 = vrot.slane %v42_v17, %v859_v15 }
  0x98   :  { %455 = vmatpush1.msra.mxu0 %v409_v43  ;;  %526 = vmatpush1.msra.mxu1 %v411_v42  ;;  %v185_v61 = vmul.f32 %v171_v51, %v159_v52  ;;  %v55_v51 = vrot.slane %v42_v17, %v857_v14 }
  0x99   :  { %456 = vmatprep.subr.mxu0 %v406_v44  ;;  %527 = vmatprep.subr.mxu1 %v408_v45  ;;  %v47_v44 = vrot.slane %v42_v17, %v866_v20 }
  0x9a   :  { %v155_v48 = vpop.permute.xlu1 %154  ;;  %457 = vmatpush1.msra.mxu0 %v405_v46  ;;  %528 = vmatpush1.msra.mxu1 %v407_v47  ;;  %v153_v49 = vpop.permute.xlu0 %152  ;;  %v365_v23 = vrot.slane %v185_v61, 4 }
  0x9b   :  { %v160_v53 = vsel %vm156_vm5, %v155_v48, %v149_v39  ;;  %v157_v58 = vsel %vm156_vm5, %v153_v49, %v155_v48  ;;  %v158_v59 = vsel %vm156_vm5, %v151_v38, %v153_v49 }
  0x9c   :  { %v184_v63 = vmul.f32 %v167_v3, %v160_v53  ;;  %v186_v7 = vmul.f32 %v175_v54, %v158_v59  ;;  %v187_v9 = vmul.f32 %v179_v55, %v157_v58 }
  0x9e   :  { %v71_v5 = vpop.permute.xlu1 %70  ;;  %v69_v4 = vpop.permute.xlu0 %68  ;;  %v364_v27 = vrot.slane %v184_v63, 4  ;;  %v366_v30 = vrot.slane %v186_v7, 4  ;;  %v367_v31 = vrot.slane %v187_v9, 4  ;;  %v413_v63 = vld [vmem:[%s1019_s1] sm:$0xff] }
  0x9f   :  { %v79_v18 = vsel %vm76_vm6, %v69_v4, %v71_v5 }
  0xa0   :  { %v105_v32 = vmul.f32 %v91_v10, %v79_v18 }
  0xa2   :  { %v75_v56 = vpop.permute.xlu1 %74  ;;  %v73_v57 = vpop.permute.xlu0 %72  ;;  %v353_v52 = vrot.slane %v105_v32, 4 }
  0xa3   :  { %v80_v36 = vsel %vm76_vm6, %v75_v56, %v69_v4  ;;  %v78_v16 = vsel %vm76_vm6, %v71_v5, %v73_v57  ;;  %v77_v43 = vsel %vm76_vm6, %v73_v57, %v75_v56 }
  0xa4   :  { %v104_v45 = vmul.f32 %v87_v8, %v80_v36  ;;  %v106_v4 = vmul.f32 %v95_v19, %v78_v16  ;;  %v107_v3 = vmul.f32 %v99_v28, %v77_v43 }
  0xa6   :  { %v111_v11 = vpop.permute.xlu1 %110  ;;  %v109_v12 = vpop.permute.xlu0 %108  ;;  %v352_v53 = vrot.slane %v104_v45, 4  ;;  %v354_v57 = vrot.slane %v106_v4, 4  ;;  %v355_v60 = vrot.slane %v107_v3, 4 }
  0xa7   :  { %v119_v21 = vsel %vm116_vm7, %v109_v12, %v111_v11 }
  0xa8   :  { %v145_v24 = vmul.f32 %v131_v62, %v119_v21  ;;  %v576_v21 = vld [vmem:[%s1020_s2] sm:$0xf] }
  0xaa   :  { %v115_v33 = vpop.permute.xlu1 %114  ;;  %v113_v34 = vpop.permute.xlu0 %112  ;;  %v402_v35 = vsel %vm396_vm1, %v145_v24, %v365_v23 }
  0xab   :  { %v120_v37 = vsel %vm116_vm7, %v115_v33, %v109_v12  ;;  %v117_v38 = vsel %vm116_vm7, %v113_v34, %v115_v33  ;;  %v118_v39 = vsel %vm116_vm7, %v111_v11, %v113_v34  ;;  %458 = vmatprep.subr.mxu0 %v402_v35 }
  0xac   :  { %v144_v40 = vmul.f32 %v127_v22, %v120_v37  ;;  %v146_v41 = vmul.f32 %v135_v25, %v118_v39  ;;  %v147_v42 = vmul.f32 %v139_v26, %v117_v38 }
  0xae   :  { %v30_v46 = vpop.permute.xlu1 %29  ;;  %v28_v47 = vpop.permute.xlu0 %27  ;;  %v401_v48 = vsel %vm396_vm1, %v144_v40, %v364_v27  ;;  %v404_v49 = vsel %vm396_vm1, %v147_v42, %v367_v31  ;;  %v403_v50 = vsel %vm396_vm1, %v146_v41, %v366_v30 }
  0xaf   :  { %v40_v5 = vsel %vm37_vm8, %v28_v47, %v30_v46  ;;  %459 = vmatpush1.msra.mxu0 %v401_v48  ;;  %529 = vmatprep.subr.mxu1 %v404_v49 }
  0xb0   :  { %v65_v20 = vmul.f32 %v51_v29, %v40_v5  ;;  %530 = vmatpush1.msra.mxu1 %v403_v50 }
  0xb2   :  { %v34_v54 = vpop.permute.xlu1 %33  ;;  %v32_v55 = vpop.permute.xlu0 %31  ;;  %v398_v56 = vsel %vm396_vm1, %v65_v20, %v353_v52 }
  0xb3   :  { %v41_v58 = vsel %vm37_vm8, %v34_v54, %v28_v47  ;;  %v38_v59 = vsel %vm37_vm8, %v32_v55, %v34_v54  ;;  %v39_v14 = vsel %vm37_vm8, %v30_v46, %v32_v55  ;;  %460 = vmatprep.subr.mxu0 %v398_v56 }
  0xb4   :  { %v64_v61 = vmul.f32 %v47_v44, %v41_v58  ;;  %v66_v62 = vmul.f32 %v55_v51, %v39_v14  ;;  %v67_v15 = vmul.f32 %v59_v2, %v38_v59 }
  0xb6   :  { %v397_v7 = vsel %vm396_vm1, %v64_v61, %v352_v53  ;;  %v400_v9 = vsel %vm396_vm1, %v67_v15, %v355_v60  ;;  %v399_v10 = vsel %vm396_vm1, %v66_v62, %v354_v57 }
  0xb7   :  { %461 = vmatpush1.msra.mxu0 %v397_v7  ;;  %531 = vmatprep.subr.mxu1 %v400_v9 }
  0xb8   :  { %748 = vmatmul.mubr.msk.f32.vlgmr.msra.gmra.mxu0 %vm414_vm9, %v413_v63  ;;  %532 = vmatpush1.msra.mxu1 %v399_v10 }
  0xb9   :  { %751 = vmatmul.mubr.msk.f32.vlgmr.msra.gmra.mxu1 %vm414_vm9, %v413_v63  ;;  %645 = vmatprep.mubr.f32.mxu0 %v770_v6 }
  0xba   :  { %716 = vmatprep.mubr.f32.mxu1 %v770_v6 }
 0x178   :  { %v496_v13 = vpop.f32.mrf.mxu0 }
 0x179   :  { %v567_v8 = vpop.f32.mrf.mxu1  ;;  %v572_v18 = vmax.f32 %v496_v13, 0.0 }
 0x17a   :  { %v498_v11 = vpop.f32.mrf.mxu0  ;;  %v574_v22 = vmax.f32 %v567_v8, 0.0 }
 0x17b   :  { %v573_v12 = vmax.f32 %v498_v11, 0.0  ;;  %v569_v17 = vpop.f32.mrf.mxu1 }
 0x17c   :  { %v575_v19 = vmax.f32 %v569_v17, 0.0 }
 0x17d   :  { %611 = vmatprep.subr.mxu0 %v573_v12 }
 0x17e   :  { %612 = vmatpush1.msra.mxu0 %v572_v18  ;;  %682 = vmatprep.subr.mxu1 %v575_v19 }
 0x17f   :  { %683 = vmatpush1.msra.mxu1 %v574_v22  ;;  %752 = vmatmul.mubr.msk.f32.vlgmr.msra.gmra.mxu0 %vm577_vm10, %v576_v21 }
 0x180   :  { %753 = vmatmul.mubr.msk.f32.vlgmr.msra.gmra.mxu1 %vm577_vm10, %v576_v21 }
 0x23f   :  { %v647_v6 = vpop.f32.mrf.mxu0 }
 0x240   :  { %v718_v23 = vpop.f32.mrf.mxu1 }
 0x241   :  { %v649_v24 = vpop.f32.mrf.mxu0 }
 0x242   :  { %v727_v25 = vcombine.low %v647_v6, %v649_v24  ;;  %v720_v26 = vpop.f32.mrf.mxu1 }
 0x243   :  { %v728_v27 = vcombine.low %v718_v23, %v720_v26 }
 0x244   :  { %v731_v28 = vadd.f32 %v727_v25, %v805_v1 }
 0x245   :  { %v732_v29 = vadd.f32 %v728_v27, %v800_v0 }
 0x246   :  { %733 = vst [vmem:[%s1021_s4] sm:$0xff] %v731_v28 }
 0x247   :  { %734 = vst [vmem:[%s1021_s4 + $0x8] sm:$0xff] %v732_v29 }

</bundles_post_ra>
